<compile_context>
chip_gen: v7x
topology: tpu7x:2x2x1
jax: 0.10.0
libtpu: 0.0.40
codegen_flags: <defaults>
</compile_context>

<pallas_src>
import jax
import jax.numpy as jnp
from jax.experimental import pallas as pl
from jax.experimental.pallas import tpu as pltpu


def decoder_kernel(z_ref, ablk_ref, cterm_ref, w3_ref, b3_ref, w4_ref, b4_ref,
                   out_ref):
    # x = block_diag(ainv) @ z_flat + precomputed_bias_term        (B*V, L)
    x = jnp.dot(ablk_ref[...], z_ref[...],
                preferred_element_type=jnp.float32) + cterm_ref[...]

    # h = relu(x @ W3 + b3)                                        (B*V, H)
    h = jnp.dot(x, w3_ref[...],
                preferred_element_type=jnp.float32) + b3_ref[...]
    h = jnp.maximum(h, 0.0)

    # out = h @ W4_pad + b4_pad   (lane-dense padded O)            (B*V, O_pad)
    out_ref[...] = jnp.dot(h, w4_ref[...],
                           preferred_element_type=jnp.float32) + b4_ref[...]


def decoder_forward(z, adj_A, enc_bias, w3, b3, w4, b4):
    """z: (B, V, L). Returns (B, V, O)."""
    B, V, L = z.shape
    H = w3.shape[1]
    O = w4.shape[1]
    O_pad = ((O + 127) // 128) * 128   # lane-dense output store

    # amped_adj_inv = (I - sinh(3*adj_A)^T)^-1
    # TODO(synk): matrix inverse has no clean Pallas equivalent (needs LU);
    # computed with jnp.linalg.inv in plain JAX glue next to the kernel.
    amped_adj = jnp.sinh(3.0 * adj_A)
    ainv = jnp.linalg.inv(jnp.eye(V, dtype=jnp.float32) - amped_adj.T)

    # Block-diagonal graph operator over the batch: (B*V, B*V).
    # NOTE: O(B^2 * V^2) memory — fine at these shapes; re-tile if B*V scales.
    ablk = jnp.kron(jnp.eye(B, dtype=jnp.float32), ainv)

    # Bias hoist: ainv @ (z + bias) - bias == ainv @ z + (rowsum(ainv)-1)[:,None]*bias
    cterm_v = (jnp.sum(ainv, axis=1) - 1.0)[:, None] * enc_bias[None, :]   # (V, L)
    cterm = jnp.tile(cterm_v, (B, 1))                                      # (B*V, L)

    z_flat = z.reshape(B * V, L)

    b3_2d = b3.reshape(1, H)
    w4_pad = jnp.zeros((H, O_pad), jnp.float32).at[:, :O].set(w4)
    b4_pad = jnp.zeros((1, O_pad), jnp.float32).at[:, :O].set(b4.reshape(1, O))

    vmem = pl.BlockSpec(memory_space=pltpu.MemorySpace.VMEM)
    out_pad = pl.pallas_call(
        decoder_kernel,
        out_shape=jax.ShapeDtypeStruct((B * V, O_pad), jnp.float32),
        in_specs=[vmem] * 7,          # whole arrays resident in VMEM, single invocation
        out_specs=vmem,
    )(z_flat, ablk, cterm, w3, b3_2d, w4_pad, b4_pad)

    return out_pad[:, :O].reshape(B, V, O)


def reference_forward(z, adj_A, enc_bias, w3, b3, w4, b4):
    V = adj_A.shape[0]
    amped_adj = jnp.sinh(3.0 * adj_A)
    ainv = jnp.linalg.inv(jnp.eye(V, dtype=jnp.float32) - amped_adj.T)
    x = jnp.einsum('vw,bwl->bvl', ainv, z + enc_bias) - enc_bias
    h = jnp.maximum(jnp.einsum('bvl,lh->bvh', x, w3) + b3, 0.0)
    return jnp.einsum('bvh,ho->bvo', h, w4) + b4


if __name__ == "__main__":
    # Small shapes consistent with the module's forward:
    B, V, L, H, O = 2, 8, 2, 32, 4   # batch, num_vars, latent_dim, hidden_dim, output_dim

    key = jax.random.PRNGKey(0)
    k_z, k_adj, k_bias, k_w3, k_b3, k_w4, k_b4 = jax.random.split(key, 7)

    z = jax.random.normal(k_z, (B, V, L), dtype=jnp.float32)

    # Encoder parameters (adj_A is zeros in __init__; use small random values
    # so the graph matmul is non-trivial — this is a synthetic init).
    adj_A = 0.1 * jax.random.normal(k_adj, (V, V), dtype=jnp.float32)
    enc_bias = 0.1 * jax.random.normal(k_bias, (L,), dtype=jnp.float32)

    # Decoder linear layers (nn.Linear-style uniform init, deterministic).
    w3 = jax.random.uniform(k_w3, (L, H), jnp.float32, -1.0, 1.0) / jnp.sqrt(L)
    b3 = jax.random.uniform(k_b3, (H,), jnp.float32, -1.0, 1.0) / jnp.sqrt(L)
    w4 = jax.random.uniform(k_w4, (H, O), jnp.float32, -1.0, 1.0) / jnp.sqrt(H)
    b4 = jax.random.uniform(k_b4, (O,), jnp.float32, -1.0, 1.0) / jnp.sqrt(H)

    out = decoder_forward(z, adj_A, enc_bias, w3, b3, w4, b4)
    out = jax.block_until_ready(out)

    ref = reference_forward(z, adj_A, enc_bias, w3, b3, w4, b4)
    assert out.shape == (B, V, O)
    assert jnp.allclose(out, ref, atol=1e-4, rtol=1e-4), "mismatch vs reference"

    print("KERNEL_OK")
</pallas_src>

<mosaic_0001>
module attributes {stable_mosaic.version = 11 : i64} {
  func.func @decoder_kernel(%arg0: memref<16x2xf32, #tpu.memory_space<vmem>>, %arg1: memref<16x16xf32, #tpu.memory_space<vmem>>, %arg2: memref<16x2xf32, #tpu.memory_space<vmem>>, %arg3: memref<2x32xf32, #tpu.memory_space<vmem>>, %arg4: memref<1x32xf32, #tpu.memory_space<vmem>>, %arg5: memref<32x128xf32, #tpu.memory_space<vmem>>, %arg6: memref<1x128xf32, #tpu.memory_space<vmem>>, %arg7: memref<16x128xf32, #tpu.memory_space<vmem>>) attributes {dimension_semantics = [], scalar_prefetch = 0 : i64, scratch_operands = 0 : i64, tpu.core_type = #tpu.core_type<tc>} {
    %c0 = arith.constant 0 : index
    %c0_0 = arith.constant 0 : index
    %0 = vector.load %arg1[%c0, %c0_0] : memref<16x16xf32, #tpu.memory_space<vmem>>, vector<16x16xf32>
    %c0_1 = arith.constant 0 : index
    %c0_2 = arith.constant 0 : index
    %1 = vector.load %arg0[%c0_1, %c0_2] : memref<16x2xf32, #tpu.memory_space<vmem>>, vector<16x2xf32>
    %cst = arith.constant dense<0.000000e+00> : vector<16x2xf32>
    %2 = tpu.matmul %0, %1, %cst {dimension_numbers = #tpu.dot_dimension_numbers<[1], [0], [0], [1], [0, 0, 1, 1], [], []>} : vector<16x16xf32>, vector<16x2xf32>, vector<16x2xf32> -> vector<16x2xf32>
    %c0_3 = arith.constant 0 : index
    %c0_4 = arith.constant 0 : index
    %3 = vector.load %arg2[%c0_3, %c0_4] : memref<16x2xf32, #tpu.memory_space<vmem>>, vector<16x2xf32>
    %4 = arith.addf %2, %3 : vector<16x2xf32>
    %c0_5 = arith.constant 0 : index
    %c0_6 = arith.constant 0 : index
    %5 = vector.load %arg3[%c0_5, %c0_6] : memref<2x32xf32, #tpu.memory_space<vmem>>, vector<2x32xf32>
    %cst_7 = arith.constant dense<0.000000e+00> : vector<16x32xf32>
    %6 = tpu.matmul %4, %5, %cst_7 {dimension_numbers = #tpu.dot_dimension_numbers<[1], [0], [0], [1], [0, 0, 1, 1], [], []>} : vector<16x2xf32>, vector<2x32xf32>, vector<16x32xf32> -> vector<16x32xf32>
    %c0_8 = arith.constant 0 : index
    %c0_9 = arith.constant 0 : index
    %7 = vector.load %arg4[%c0_8, %c0_9] : memref<1x32xf32, #tpu.memory_space<vmem>>, vector<1x32xf32>
    %8 = vector.broadcast %7 : vector<1x32xf32> to vector<16x32xf32>
    %9 = arith.addf %6, %8 : vector<16x32xf32>
    %cst_10 = arith.constant 0.000000e+00 : f32
    %10 = vector.broadcast %cst_10 : f32 to vector<16x32xf32>
    %11 = arith.maximumf %9, %10 : vector<16x32xf32>
    %c0_11 = arith.constant 0 : index
    %c0_12 = arith.constant 0 : index
    %12 = vector.load %arg5[%c0_11, %c0_12] : memref<32x128xf32, #tpu.memory_space<vmem>>, vector<32x128xf32>
    %cst_13 = arith.constant dense<0.000000e+00> : vector<16x128xf32>
    %13 = tpu.matmul %11, %12, %cst_13 {dimension_numbers = #tpu.dot_dimension_numbers<[1], [0], [0], [1], [0, 0, 1, 1], [], []>} : vector<16x32xf32>, vector<32x128xf32>, vector<16x128xf32> -> vector<16x128xf32>
    %c0_14 = arith.constant 0 : index
    %c0_15 = arith.constant 0 : index
    %14 = vector.load %arg6[%c0_14, %c0_15] : memref<1x128xf32, #tpu.memory_space<vmem>>, vector<1x128xf32>
    %15 = vector.broadcast %14 : vector<1x128xf32> to vector<16x128xf32>
    %16 = arith.addf %13, %15 : vector<16x128xf32>
    %c0_16 = arith.constant 0 : index
    %c0_17 = arith.constant 0 : index
    %17 = vector.load %arg7[%c0_16, %c0_17] : memref<16x128xf32, #tpu.memory_space<vmem>>, vector<16x128xf32>
    tpu.vector_store %arg7[%c0_16, %c0_17], %16 {strides = array<i32>} : memref<16x128xf32, #tpu.memory_space<vmem>>, vector<16x128xf32>,
    return
  }
}

</mosaic_0001>

<bundles_post_ra>
// kernel: tpu_custom_call.1
= control target key start
LH: loop header
LB: loop body
LE: loop exit
PB: predicated region body
PF: predicated region fallthrough
CT: control target
= control target key end

     0   :  { %vm33_vm0 = vcmask 130048   ;;  %s500_s0 = inlined_call_operand.vmem [shape: f32[16,2], index: 0, kind: input, shape index: {}]   ;;  %s501_s1 = inlined_call_operand.vmem [shape: f32[16,16], index: 1, kind: input, shape index: {}]   ;;  %s502_s2 = inlined_call_operand.vmem [shape: f32[16,2], index: 2, kind: input, shape index: {}]   ;;  %s503_s3 = inlined_call_operand.vmem [shape: f32[2,32], index: 3, kind: input, shape index: {}]   ;;  %s504_s4 = inlined_call_operand.vmem [shape: f32[1,32], index: 4, kind: input, shape index: {}]   ;;  %s505_s5 = inlined_call_operand.vmem [shape: f32[32,128], index: 5, kind: input, shape index: {}]   ;;  %s506_s6 = inlined_call_operand.vmem [shape: f32[1,128], index: 6, kind: input, shape index: {}]   ;;  %s507_s7 = inlined_call_operand.hbm [shape: f32[16,128], index: 7, kind: output, shape index: {}]  }
   0x1   :  { %v29_v0 = vld [vmem:[%s500_s0] sm:$0xff]  ;;  %v30_v1 = vld [vmem:[%s500_s0 + $0x8] sm:$0xff] }
   0x2   :  { %v27_v2 = vld [vmem:[%s501_s1] sm:$0xff]  ;;  %v367_v3 = vpack.c.bf16 %v30_v1, %v29_v0 }
   0x3   :  { %348 = vmatprep.mubr.msk.f32.mxu0 %vm33_vm0, %v27_v2 }
   0x4   :  { %12 = vsyncpa [#allocation3], 0  ;;  %368 = vmatprep.subr.bf16.mxu0 %v367_v3  ;;  %v28_v4 = vld [vmem:[%s501_s1 + $0x8] sm:$0xff]  ;;  %v115_v5 = vld [vmem:[%s503_s3] sm:$0x3]  ;;  %vm130_vm1 = vcmask 1041408  }
   0x5   :  { %370 = vmatpush3.bf16.msra.mxu0 %v367_v3  ;;  %v211_v6 = vld [vmem:[%s505_s5] sm:$0xff]  ;;  %v212_v7 = vld [vmem:[%s505_s5 + $0x8] sm:$0xff]  ;;  %vm123_vm2 = vcmask 15360   ;;  %v213_v15 = vld [vmem:[%s505_s5 + $0x10] sm:$0xff]  ;;  %vm222_vm3 = vcmask 261120  }
   0x6   :  { %351 = vmatprep.subr.msk.mxu0 %vm130_vm1, %v115_v5  ;;  %v371_v8 = vpack.c.bf16 %v212_v7, %v211_v6  ;;  %v31_v9 = vld [vmem:[%s502_s2] sm:$0xff]  ;;  %v32_v10 = vld [vmem:[%s502_s2 + $0x8] sm:$0xff]  ;;  %v214_v16 = vld [vmem:[%s505_s5 + $0x18] sm:$0xff]  ;;  %s406_s5 = smov [#allocation2]  }
   0x7   :  { %v375_v17 = vpack.c.bf16 %v214_v16, %v213_v15  ;;  %v324_v18 = vld [vmem:[%s504_s4] ss:$0 sm:$0xff]  ;;  %s311_s23 = sshll.u32 %s406_s5, 4  ;;  %s312_s23 = int_to_ptr.vmem [resolvable:$true] %s311_s23 }
   0x8   :  { %349 = vmatmul.mubr.msk.f32.vlgmr.msra.gmra.mrb[0].mxu0 %vm33_vm0, %v28_v4  ;;  %372 = vmatprep.subr.bf16.mxu1 %v371_v8  ;;  %v328_v25 = vld [vmem:[%s506_s6] ss:$0 sm:$0xff]  ;;  %s382_s4 = scalar_lea.vmem %s312_s23, 256  ;;  %p387_p1 = scmp.lt.s32.totalorder %s312_s23, %s312_s23 }
   0x9   :  { %352 = vmatpush3.msk.msra.mxu0 %vm130_vm1, %v115_v5  ;;  %374 = vmatpush3.bf16.msra.mxu1 %v371_v8  ;;  %p383_p0 = scmp.ne.s32.totalorder %s312_s23, %s382_s4  ;;  %p388_p2 = scmp.lt.s32.totalorder %s382_s4, %s382_s4 }
   0xa   :  { %376 = vmatprep.subr.bf16.mxu1 %v375_v17 }
   0xb   :  { %p389_p3 = por %p388_p2, %p387_p1 }
   0xd   :  { %378 = vmatpush3.bf16.msra.mxu1 %v375_v17  ;;  %p390_p4 = pnand %p389_p3, %p383_p0 }
  0xdb   :  { %v350_v11 = vpop.f32.mrb[0].mxu0 }
  0xdc   :  { %v106_v12 = vpop.f32.mrb[1].mxu0  ;;  %v112_v14 = vadd.f32 %v350_v11, %v32_v10 }
  0xdd   :  { %v107_v13 = vadd.f32 %v106_v12, %v31_v9 }
  0xdf   :  { %353 = vmatprep.mubr.msk.f32.mxu0 %vm123_vm2, %v107_v13 }
  0xe0   :  { %354 = vmatmul.mubr.msk.f32.vlgmr.msra.gmra.mrb[2].mxu0 %vm123_vm2, %v112_v14 }
 0x1b3   :  { %v355_v19 = vpop.f32.mrb[2].mxu0 }
 0x1b4   :  { %v206_v20 = vadd.f32 %v355_v19, %v324_v18  ;;  %v200_v21 = vpop.f32.mrb[3].mxu0 }
 0x1b5   :  { %v201_v22 = vadd.f32 %v324_v18, %v200_v21 }
 0x1b6   :  { %v210_v24 = vmax.f32 %v206_v20, 0.0 }
 0x1b7   :  { %v209_v23 = vmax.f32 %v201_v22, 0.0 }
 0x1b9   :  { %364 = vmatprep.mubr.msk.f32.mxu1 %vm222_vm3, %v209_v23 }
 0x1ba   :  { %365 = vmatmul.mubr.msk.f32.vlgmr.msra.gmra.mrb[0].mxu1 %vm222_vm3, %v210_v24 }
 0x28d   :  { %v366_v26 = vpop.f32.mrb[0].mxu1 }
 0x28e   :  { %v301_v27 = vadd.f32 %v366_v26, %v328_v25  ;;  %v295_v28 = vpop.f32.mrb[1].mxu1 }
 0x28f   :  { %v296_v29 = vadd.f32 %v328_v25, %v295_v28 }
 0x290   :  { %305 = vst [vmem:[#allocation2 + $0x8] sm:$0xff] %v301_v27 }
 0x291   :  { %304 = vst [vmem:[#allocation2] sm:$0xff] %v296_v29 }
 0x292   :  { %393 = shalt.err (!%p390_p4)
}
 0x293   :  { %s394_s6 = scalar_lea.hbm %s507_s7, 256 }
 0x294   :  { %p395_p5 = scmp.ne.s32.totalorder %s507_s7, %s394_s6  ;;  %p398_p6 = scmp.lt.u32.totalorder %s394_s6, %s507_s7 }
 0x296   :  { %p400_p7 = pnand %p398_p6, %p395_p5 }
 0x298   :  { %403 = shalt.err (!%p400_p7)
}
 0x299   :  { %s407_s30 = smov 128   ;;  %s408_s8 = smov 8  }
 0x29a   :  { %317 = dma.vmem_to_hbm [thread:$0]  %s312_s23, 256, %s507_s7, [#allocation3], %s407_s30, %s407_s30, %s408_s8  }
 0x29b   :  { %404 = dma.done.wait [#allocation3], 256  }
 0x29c   :  { %405 = vsyncadd [#allocation3], 4294967040 }
 0x29d   :  { %321 = vsyncpa [#allocation3], 1 }

</bundles_post_ra>
